<compile_context>
chip_gen: v7x
topology: tpu7x:2x2x1
jax: 0.10.0
libtpu: 0.0.40
codegen_flags: <defaults>
</compile_context>

<pallas_src>
import functools
import math

import jax
import jax.numpy as jnp
from jax import lax
from jax.experimental import pallas as pl
from jax.experimental.pallas import tpu as pltpu


def _layernorm_f32(h, gamma, beta, eps=1e-5):
    """LayerNorm over the last dim; statistics in f32."""
    mu = jnp.mean(h, axis=-1, keepdims=True)
    var = jnp.mean(jnp.square(h - mu), axis=-1, keepdims=True)
    return (h - mu) * lax.rsqrt(var + eps) * gamma + beta


def gpt_block_kernel(x_ref, ln1_g_ref, ln1_b_ref, ln2_g_ref, ln2_b_ref,
                     w_q_ref, w_k_ref, w_v_ref, w_out_ref, w_fc_ref,
                     w_proj_ref, o_ref, *, n_heads, head_dim):
    L, C = x_ref.shape                       # batch dim squeezed by BlockSpec
    H, D = n_heads, head_dim
    f32 = jnp.float32
    cdt = w_q_ref.dtype                      # matmul operand dtype (bf16-capable)

    # Residual stream kept in f32 for accumulation accuracy.
    x = x_ref[...].astype(f32)               # (L, C)

    # ---------------- attention: x + out_proj(attn(ln1(x))) ----------------
    h1 = _layernorm_f32(x, ln1_g_ref[0].astype(f32),
                        ln1_b_ref[0].astype(f32)).astype(cdt)      # (L, C)

    # Three full-width projections (K = C contraction, MXU-friendly).
    q = jnp.dot(h1, w_q_ref[...], preferred_element_type=f32)      # (L, C)
    k = jnp.dot(h1, w_k_ref[...], preferred_element_type=f32)      # (L, C)
    v = jnp.dot(h1, w_v_ref[...], preferred_element_type=f32)      # (L, C)

    # Fold the 1/sqrt(D) scale into q (cheaper than scaling (H, L, L) scores).
    q = q * (1.0 / math.sqrt(D))

    def to_heads(t):                          # (L, C) -> (H, L, D), head-major
        return jnp.transpose(t.astype(cdt).reshape(L, H, D), (1, 0, 2))

    qh, kh, vh = to_heads(q), to_heads(k), to_heads(v)

    # Additive causal bias: 0 where j <= i, -1e30 otherwise (no -inf select).
    row = lax.broadcasted_iota(jnp.int32, (L, L), 0)
    col = lax.broadcasted_iota(jnp.int32, (L, L), 1)
    bias = jnp.where(row >= col, 0.0, -1e30).astype(f32)            # (L, L)

    # Batched contraction over all heads at once.
    s = jnp.einsum('hld,hmd->hlm', qh, kh,
                   preferred_element_type=f32)                      # (H, L, L)
    s = s + bias[None]
    m = jnp.max(s, axis=-1, keepdims=True)
    p = jnp.exp(s - m)
    denom = jnp.sum(p, axis=-1, keepdims=True)
    p = p * pl.reciprocal(denom, approx=True)                       # EUP slot

    o = jnp.einsum('hlm,hmd->hld', p.astype(cdt), vh,
                   preferred_element_type=f32)                      # (H, L, D)

    # Merge heads back to (L, C) and apply the output projection as one big
    # (L, C) @ (C, C) matmul.
    attn = jnp.transpose(o, (1, 0, 2)).reshape(L, C).astype(cdt)
    x = x + jnp.dot(attn, w_out_ref[...], preferred_element_type=f32)

    # ---------------- MLP: x + c_proj(relu(c_fc(ln2(x)))) ----------------
    h2 = _layernorm_f32(x, ln2_g_ref[0].astype(f32),
                        ln2_b_ref[0].astype(f32)).astype(cdt)       # (L, C)
    ff = jnp.dot(h2, w_fc_ref[...], preferred_element_type=f32)     # (L, 4C)
    ff = jnp.maximum(ff, 0.0).astype(cdt)                           # relu
    x = x + jnp.dot(ff, w_proj_ref[...], preferred_element_type=f32)

    o_ref[...] = x.astype(o_ref.dtype)


def gpt_block(x, params, *, n_heads, head_dim):
    """x: (B, L, C). Linear weights passed as (in_features, out_features)."""
    B, L, C = x.shape
    (ln1_g, ln1_b, ln2_g, ln2_b, w_q, w_k, w_v, w_out, w_fc, w_proj) = params

    kernel = functools.partial(gpt_block_kernel,
                               n_heads=n_heads, head_dim=head_dim)

    def full_spec(arr):
        nd = arr.ndim
        # Constant block index across the grid => DMA'd once, stays resident.
        return pl.BlockSpec(arr.shape, lambda b, _nd=nd: (0,) * _nd)

    return pl.pallas_call(
        kernel,
        out_shape=jax.ShapeDtypeStruct((B, L, C), x.dtype),
        grid_spec=pltpu.PrefetchScalarGridSpec(
            num_scalar_prefetch=0,
            grid=(B,),
            in_specs=[
                # Batch dim squeezed: kernel sees a clean (L, C) ref.
                pl.BlockSpec((None, L, C), lambda b: (b, 0, 0)),
                full_spec(ln1_g), full_spec(ln1_b),
                full_spec(ln2_g), full_spec(ln2_b),
                full_spec(w_q), full_spec(w_k), full_spec(w_v),
                full_spec(w_out), full_spec(w_fc), full_spec(w_proj),
            ],
            out_specs=pl.BlockSpec((None, L, C), lambda b: (b, 0, 0)),
        ),
        compiler_params=pltpu.CompilerParams(
            dimension_semantics=("parallel",)),
    )(x, ln1_g, ln1_b, ln2_g, ln2_b, w_q, w_k, w_v, w_out, w_fc, w_proj)


def reference_gpt_block(x, params, *, n_heads, head_dim):
    """Pure-JAX reference mirroring the PyTorch forward."""
    (ln1_g, ln1_b, ln2_g, ln2_b, w_q, w_k, w_v, w_out, w_fc, w_proj) = params
    B, L, C = x.shape

    def ln(h, g, b):
        mu = jnp.mean(h, axis=-1, keepdims=True)
        var = jnp.mean((h - mu) ** 2, axis=-1, keepdims=True)
        return (h - mu) / jnp.sqrt(var + 1e-5) * g[0] + b[0]

    h = ln(x, ln1_g, ln1_b)
    q, k, v = h @ w_q, h @ w_k, h @ w_v

    def heads(t):
        return jnp.transpose(t.reshape(B, L, n_heads, head_dim), (0, 2, 1, 3))

    q, k, v = heads(q), heads(k), heads(v)
    scores = q @ jnp.swapaxes(k, -1, -2) * (1.0 / math.sqrt(head_dim))
    mask = jnp.tril(jnp.ones((L, L), bool))
    scores = jnp.where(mask[None, None], scores, -jnp.inf)
    attn = jax.nn.softmax(scores, axis=-1)
    out = jnp.transpose(attn @ v, (0, 2, 1, 3)).reshape(B, L, C)
    x = x + out @ w_out
    h2 = ln(x, ln2_g, ln2_b)
    x = x + jnp.maximum(h2 @ w_fc, 0.0) @ w_proj
    return x


if __name__ == "__main__":
    # Small, module-consistent shapes.
    n_heads = 4
    embed_dim_per_head = 8
    C = n_heads * embed_dim_per_head      # 32
    L = 8                                 # block_size == sequence length
    B = 2

    key = jax.random.PRNGKey(0)
    (kx, kq, kk, kv, ko, kf, kp, kg1, kb1, kg2, kb2) = jax.random.split(key, 11)

    x = jax.random.normal(kx, (B, L, C), dtype=jnp.float32)

    # Deterministic parameters (bias=False everywhere; LN gamma/beta nontrivial).
    ln1_g = 1.0 + 0.1 * jax.random.normal(kg1, (1, C), jnp.float32)
    ln1_b = 0.1 * jax.random.normal(kb1, (1, C), jnp.float32)
    ln2_g = 1.0 + 0.1 * jax.random.normal(kg2, (1, C), jnp.float32)
    ln2_b = 0.1 * jax.random.normal(kb2, (1, C), jnp.float32)
    # Linear weights stored as (in_features, out_features) == PyTorch W.T
    # (cast these to bf16 for v6e/v7x peak MXU throughput; kernel follows dtype).
    w_q = 0.02 * jax.random.normal(kq, (C, C), jnp.float32)
    w_k = 0.02 * jax.random.normal(kk, (C, C), jnp.float32)
    w_v = 0.02 * jax.random.normal(kv, (C, C), jnp.float32)
    w_out = 0.02 * jax.random.normal(ko, (C, C), jnp.float32)
    w_fc = 0.02 * jax.random.normal(kf, (C, 4 * C), jnp.float32)
    w_proj = 0.02 * jax.random.normal(kp, (4 * C, C), jnp.float32)

    params = (ln1_g, ln1_b, ln2_g, ln2_b,
              w_q, w_k, w_v, w_out, w_fc, w_proj)

    out = gpt_block(x, params, n_heads=n_heads, head_dim=embed_dim_per_head)
    out = jax.block_until_ready(out)

    ref = reference_gpt_block(x, params, n_heads=n_heads,
                              head_dim=embed_dim_per_head)
    assert out.shape == (B, L, C)
    # Tolerance accounts for the approximate (EUP) reciprocal in the softmax.
    assert jnp.allclose(out, ref, atol=1e-3, rtol=1e-3), "mismatch vs reference"

    print("KERNEL_OK")
</pallas_src>

<mosaic_0001>
module attributes {stable_mosaic.version = 11 : i64} {
  func.func @gpt_block_kernel(%arg0: i32, %arg1: memref<1x8x32xf32, #tpu.memory_space<vmem>>, %arg2: memref<1x32xf32, #tpu.memory_space<vmem>>, %arg3: memref<1x32xf32, #tpu.memory_space<vmem>>, %arg4: memref<1x32xf32, #tpu.memory_space<vmem>>, %arg5: memref<1x32xf32, #tpu.memory_space<vmem>>, %arg6: memref<32x32xf32, #tpu.memory_space<vmem>>, %arg7: memref<32x32xf32, #tpu.memory_space<vmem>>, %arg8: memref<32x32xf32, #tpu.memory_space<vmem>>, %arg9: memref<32x32xf32, #tpu.memory_space<vmem>>, %arg10: memref<32x128xf32, #tpu.memory_space<vmem>>, %arg11: memref<128x32xf32, #tpu.memory_space<vmem>>, %arg12: memref<1x8x32xf32, #tpu.memory_space<vmem>>) attributes {dimension_semantics = [#tpu.dimension_semantics<parallel>], iteration_bounds = array<i64: 2>, scalar_prefetch = 0 : i64, scratch_operands = 0 : i64, tpu.core_type = #tpu.core_type<tc>, window_params = [{transform_indices = @transform_0, window_bounds = array<i64: 1, 8, 32>}, {pipeline_mode = #tpu.pipeline_mode<synchronous>, transform_indices = @transform_1, window_bounds = array<i64: 1, 32>}, {pipeline_mode = #tpu.pipeline_mode<synchronous>, transform_indices = @transform_2, window_bounds = array<i64: 1, 32>}, {pipeline_mode = #tpu.pipeline_mode<synchronous>, transform_indices = @transform_3, window_bounds = array<i64: 1, 32>}, {pipeline_mode = #tpu.pipeline_mode<synchronous>, transform_indices = @transform_4, window_bounds = array<i64: 1, 32>}, {pipeline_mode = #tpu.pipeline_mode<synchronous>, transform_indices = @transform_5, window_bounds = array<i64: 32, 32>}, {pipeline_mode = #tpu.pipeline_mode<synchronous>, transform_indices = @transform_6, window_bounds = array<i64: 32, 32>}, {pipeline_mode = #tpu.pipeline_mode<synchronous>, transform_indices = @transform_7, window_bounds = array<i64: 32, 32>}, {pipeline_mode = #tpu.pipeline_mode<synchronous>, transform_indices = @transform_8, window_bounds = array<i64: 32, 32>}, {pipeline_mode = #tpu.pipeline_mode<synchronous>, transform_indices = @transform_9, window_bounds = array<i64: 32, 128>}, {pipeline_mode = #tpu.pipeline_mode<synchronous>, transform_indices = @transform_10, window_bounds = array<i64: 128, 32>}, {transform_indices = @transform_11, window_bounds = array<i64: 1, 8, 32>}]} {
    %c0 = arith.constant 0 : index
    %c0_0 = arith.constant 0 : index
    %c0_1 = arith.constant 0 : index
    %0 = vector.load %arg1[%c0, %c0_0, %c0_1] : memref<1x8x32xf32, #tpu.memory_space<vmem>>, vector<1x8x32xf32>
    %1 = vector.shape_cast %0 : vector<1x8x32xf32> to vector<8x32xf32>
    %c0_2 = arith.constant 0 : index
    %c0_3 = arith.constant 0 : index
    %2 = vector.load %arg2[%c0_2, %c0_3] : memref<1x32xf32, #tpu.memory_space<vmem>>, vector<1x32xf32>
    %3 = vector.shape_cast %2 : vector<1x32xf32> to vector<32xf32>
    %c0_4 = arith.constant 0 : index
    %c0_5 = arith.constant 0 : index
    %4 = vector.load %arg3[%c0_4, %c0_5] : memref<1x32xf32, #tpu.memory_space<vmem>>, vector<1x32xf32>
    %5 = vector.shape_cast %4 : vector<1x32xf32> to vector<32xf32>
    %cst = arith.constant dense<0.000000e+00> : vector<8xf32>
    %6 = vector.multi_reduction <add>, %1, %cst [1] : vector<8x32xf32> to vector<8xf32>
    %7 = vector.shape_cast %6 : vector<8xf32> to vector<8x1xf32>
    %cst_6 = arith.constant 3.200000e+01 : f32
    %8 = vector.broadcast %cst_6 : f32 to vector<8x1xf32>
    %9 = arith.divf %7, %8 : vector<8x1xf32>
    %10 = vector.broadcast %9 : vector<8x1xf32> to vector<8x32xf32>
    %11 = arith.subf %1, %10 : vector<8x32xf32>
    %12 = arith.mulf %11, %11 : vector<8x32xf32>
    %cst_7 = arith.constant dense<0.000000e+00> : vector<8xf32>
    %13 = vector.multi_reduction <add>, %12, %cst_7 [1] : vector<8x32xf32> to vector<8xf32>
    %14 = vector.shape_cast %13 : vector<8xf32> to vector<8x1xf32>
    %cst_8 = arith.constant 3.200000e+01 : f32
    %15 = vector.broadcast %cst_8 : f32 to vector<8x1xf32>
    %16 = arith.divf %14, %15 : vector<8x1xf32>
    %17 = vector.broadcast %9 : vector<8x1xf32> to vector<8x32xf32>
    %18 = arith.subf %1, %17 : vector<8x32xf32>
    %cst_9 = arith.constant 9.99999974E-6 : f32
    %19 = vector.broadcast %cst_9 : f32 to vector<8x1xf32>
    %20 = arith.addf %16, %19 : vector<8x1xf32>
    %21 = math.rsqrt %20 : vector<8x1xf32>
    %22 = vector.broadcast %21 : vector<8x1xf32> to vector<8x32xf32>
    %23 = arith.mulf %18, %22 : vector<8x32xf32>
    %24 = vector.shape_cast %3 : vector<32xf32> to vector<1x32xf32>
    %25 = vector.broadcast %24 : vector<1x32xf32> to vector<8x32xf32>
    %26 = arith.mulf %23, %25 : vector<8x32xf32>
    %27 = vector.shape_cast %5 : vector<32xf32> to vector<1x32xf32>
    %28 = vector.broadcast %27 : vector<1x32xf32> to vector<8x32xf32>
    %29 = arith.addf %26, %28 : vector<8x32xf32>
    %c0_10 = arith.constant 0 : index
    %c0_11 = arith.constant 0 : index
    %30 = vector.load %arg6[%c0_10, %c0_11] : memref<32x32xf32, #tpu.memory_space<vmem>>, vector<32x32xf32>
    %cst_12 = arith.constant dense<0.000000e+00> : vector<8x32xf32>
    %31 = tpu.matmul %29, %30, %cst_12 {dimension_numbers = #tpu.dot_dimension_numbers<[1], [0], [0], [1], [0, 0, 1, 1], [], []>} : vector<8x32xf32>, vector<32x32xf32>, vector<8x32xf32> -> vector<8x32xf32>
    %c0_13 = arith.constant 0 : index
    %c0_14 = arith.constant 0 : index
    %32 = vector.load %arg7[%c0_13, %c0_14] : memref<32x32xf32, #tpu.memory_space<vmem>>, vector<32x32xf32>
    %cst_15 = arith.constant dense<0.000000e+00> : vector<8x32xf32>
    %33 = tpu.matmul %29, %32, %cst_15 {dimension_numbers = #tpu.dot_dimension_numbers<[1], [0], [0], [1], [0, 0, 1, 1], [], []>} : vector<8x32xf32>, vector<32x32xf32>, vector<8x32xf32> -> vector<8x32xf32>
    %c0_16 = arith.constant 0 : index
    %c0_17 = arith.constant 0 : index
    %34 = vector.load %arg8[%c0_16, %c0_17] : memref<32x32xf32, #tpu.memory_space<vmem>>, vector<32x32xf32>
    %cst_18 = arith.constant dense<0.000000e+00> : vector<8x32xf32>
    %35 = tpu.matmul %29, %34, %cst_18 {dimension_numbers = #tpu.dot_dimension_numbers<[1], [0], [0], [1], [0, 0, 1, 1], [], []>} : vector<8x32xf32>, vector<32x32xf32>, vector<8x32xf32> -> vector<8x32xf32>
    %cst_19 = arith.constant 0.353553385 : f32
    %36 = vector.broadcast %cst_19 : f32 to vector<8x32xf32>
    %37 = arith.mulf %31, %36 : vector<8x32xf32>
    %38 = vector.shape_cast %37 : vector<8x32xf32> to vector<8x4x8xf32>
    %39 = tpu.transpose %38, [1, 0, 2] : vector<8x4x8xf32> -> vector<4x8x8xf32>
    %40 = vector.shape_cast %33 : vector<8x32xf32> to vector<8x4x8xf32>
    %41 = tpu.transpose %40, [1, 0, 2] : vector<8x4x8xf32> -> vector<4x8x8xf32>
    %42 = vector.shape_cast %35 : vector<8x32xf32> to vector<8x4x8xf32>
    %43 = tpu.transpose %42, [1, 0, 2] : vector<8x4x8xf32> -> vector<4x8x8xf32>
    %44 = tpu.iota {dimensions = array<i32: 0>} : vector<8x8xi32>
    %45 = tpu.iota {dimensions = array<i32: 1>} : vector<8x8xi32>
    %46 = arith.cmpi sge, %44, %45 : vector<8x8xi32>
    %cst_20 = arith.constant 0.000000e+00 : f32
    %cst_21 = arith.constant -1.000000e+30 : f32
    %47 = vector.broadcast %cst_20 : f32 to vector<8x8xf32>
    %48 = vector.broadcast %cst_21 : f32 to vector<8x8xf32>
    %49 = arith.select %46, %47, %48 : vector<8x8xi1>, vector<8x8xf32>
    "tpu.trace_start"() <{level = 10 : i32, message = "hld,hmd->hlm"}> : () -> ()
    %cst_22 = arith.constant dense<0.000000e+00> : vector<4x8x8xf32>
    %50 = tpu.matmul %39, %41, %cst_22 {dimension_numbers = #tpu.dot_dimension_numbers<[2], [2], [1], [1], [0, 0, 0, 1, 1, 1], [0], [0]>} : vector<4x8x8xf32>, vector<4x8x8xf32>, vector<4x8x8xf32> -> vector<4x8x8xf32>
    "tpu.trace_stop"() : () -> ()
    %51 = vector.shape_cast %49 : vector<8x8xf32> to vector<1x8x8xf32>
    %52 = vector.broadcast %51 : vector<1x8x8xf32> to vector<4x8x8xf32>
    %53 = arith.addf %50, %52 : vector<4x8x8xf32>
    %cst_23 = arith.constant dense<0xFF800000> : vector<4x8xf32>
    %54 = vector.multi_reduction <maximumf>, %53, %cst_23 [2] : vector<4x8x8xf32> to vector<4x8xf32>
    %55 = vector.shape_cast %54 : vector<4x8xf32> to vector<4x8x1xf32>
    %56 = vector.broadcast %55 : vector<4x8x1xf32> to vector<4x8x8xf32>
    %57 = arith.subf %53, %56 : vector<4x8x8xf32>
    %58 = math.exp %57 : vector<4x8x8xf32>
    %cst_24 = arith.constant dense<0.000000e+00> : vector<4x8xf32>
    %59 = vector.multi_reduction <add>, %58, %cst_24 [2] : vector<4x8x8xf32> to vector<4x8xf32>
    %60 = vector.shape_cast %59 : vector<4x8xf32> to vector<4x8x1xf32>
    %61 = tpu.reciprocal %60 {approx = true} : vector<4x8x1xf32> -> vector<4x8x1xf32>
    %62 = vector.broadcast %61 : vector<4x8x1xf32> to vector<4x8x8xf32>
    %63 = arith.mulf %58, %62 : vector<4x8x8xf32>
    "tpu.trace_start"() <{level = 10 : i32, message = "hlm,hmd->hld"}> : () -> ()
    %cst_25 = arith.constant dense<0.000000e+00> : vector<4x8x8xf32>
    %64 = tpu.matmul %63, %43, %cst_25 {dimension_numbers = #tpu.dot_dimension_numbers<[2], [1], [1], [2], [0, 0, 0, 1, 1, 2], [0], [0]>} : vector<4x8x8xf32>, vector<4x8x8xf32>, vector<4x8x8xf32> -> vector<4x8x8xf32>
    "tpu.trace_stop"() : () -> ()
    %65 = tpu.transpose %64, [1, 0, 2] : vector<4x8x8xf32> -> vector<8x4x8xf32>
    %66 = vector.shape_cast %65 : vector<8x4x8xf32> to vector<8x32xf32>
    %c0_26 = arith.constant 0 : index
    %c0_27 = arith.constant 0 : index
    %67 = vector.load %arg9[%c0_26, %c0_27] : memref<32x32xf32, #tpu.memory_space<vmem>>, vector<32x32xf32>
    %cst_28 = arith.constant dense<0.000000e+00> : vector<8x32xf32>
    %68 = tpu.matmul %66, %67, %cst_28 {dimension_numbers = #tpu.dot_dimension_numbers<[1], [0], [0], [1], [0, 0, 1, 1], [], []>} : vector<8x32xf32>, vector<32x32xf32>, vector<8x32xf32> -> vector<8x32xf32>
    %69 = arith.addf %1, %68 : vector<8x32xf32>
    %c0_29 = arith.constant 0 : index
    %c0_30 = arith.constant 0 : index
    %70 = vector.load %arg4[%c0_29, %c0_30] : memref<1x32xf32, #tpu.memory_space<vmem>>, vector<1x32xf32>
    %71 = vector.shape_cast %70 : vector<1x32xf32> to vector<32xf32>
    %c0_31 = arith.constant 0 : index
    %c0_32 = arith.constant 0 : index
    %72 = vector.load %arg5[%c0_31, %c0_32] : memref<1x32xf32, #tpu.memory_space<vmem>>, vector<1x32xf32>
    %73 = vector.shape_cast %72 : vector<1x32xf32> to vector<32xf32>
    %cst_33 = arith.constant dense<0.000000e+00> : vector<8xf32>
    %74 = vector.multi_reduction <add>, %69, %cst_33 [1] : vector<8x32xf32> to vector<8xf32>
    %75 = vector.shape_cast %74 : vector<8xf32> to vector<8x1xf32>
    %cst_34 = arith.constant 3.200000e+01 : f32
    %76 = vector.broadcast %cst_34 : f32 to vector<8x1xf32>
    %77 = arith.divf %75, %76 : vector<8x1xf32>
    %78 = vector.broadcast %77 : vector<8x1xf32> to vector<8x32xf32>
    %79 = arith.subf %69, %78 : vector<8x32xf32>
    %80 = arith.mulf %79, %79 : vector<8x32xf32>
    %cst_35 = arith.constant dense<0.000000e+00> : vector<8xf32>
    %81 = vector.multi_reduction <add>, %80, %cst_35 [1] : vector<8x32xf32> to vector<8xf32>
    %82 = vector.shape_cast %81 : vector<8xf32> to vector<8x1xf32>
    %cst_36 = arith.constant 3.200000e+01 : f32
    %83 = vector.broadcast %cst_36 : f32 to vector<8x1xf32>
    %84 = arith.divf %82, %83 : vector<8x1xf32>
    %85 = vector.broadcast %77 : vector<8x1xf32> to vector<8x32xf32>
    %86 = arith.subf %69, %85 : vector<8x32xf32>
    %cst_37 = arith.constant 9.99999974E-6 : f32
    %87 = vector.broadcast %cst_37 : f32 to vector<8x1xf32>
    %88 = arith.addf %84, %87 : vector<8x1xf32>
    %89 = math.rsqrt %88 : vector<8x1xf32>
    %90 = vector.broadcast %89 : vector<8x1xf32> to vector<8x32xf32>
    %91 = arith.mulf %86, %90 : vector<8x32xf32>
    %92 = vector.shape_cast %71 : vector<32xf32> to vector<1x32xf32>
    %93 = vector.broadcast %92 : vector<1x32xf32> to vector<8x32xf32>
    %94 = arith.mulf %91, %93 : vector<8x32xf32>
    %95 = vector.shape_cast %73 : vector<32xf32> to vector<1x32xf32>
    %96 = vector.broadcast %95 : vector<1x32xf32> to vector<8x32xf32>
    %97 = arith.addf %94, %96 : vector<8x32xf32>
    %c0_38 = arith.constant 0 : index
    %c0_39 = arith.constant 0 : index
    %98 = vector.load %arg10[%c0_38, %c0_39] : memref<32x128xf32, #tpu.memory_space<vmem>>, vector<32x128xf32>
    %cst_40 = arith.constant dense<0.000000e+00> : vector<8x128xf32>
    %99 = tpu.matmul %97, %98, %cst_40 {dimension_numbers = #tpu.dot_dimension_numbers<[1], [0], [0], [1], [0, 0, 1, 1], [], []>} : vector<8x32xf32>, vector<32x128xf32>, vector<8x128xf32> -> vector<8x128xf32>
    %cst_41 = arith.constant 0.000000e+00 : f32
    %100 = vector.broadcast %cst_41 : f32 to vector<8x128xf32>
    %101 = arith.maximumf %99, %100 : vector<8x128xf32>
    %c0_42 = arith.constant 0 : index
    %c0_43 = arith.constant 0 : index
    %102 = vector.load %arg11[%c0_42, %c0_43] : memref<128x32xf32, #tpu.memory_space<vmem>>, vector<128x32xf32>
    %cst_44 = arith.constant dense<0.000000e+00> : vector<8x32xf32>
    %103 = tpu.matmul %101, %102, %cst_44 {dimension_numbers = #tpu.dot_dimension_numbers<[1], [0], [0], [1], [0, 0, 1, 1], [], []>} : vector<8x128xf32>, vector<128x32xf32>, vector<8x32xf32> -> vector<8x32xf32>
    %104 = arith.addf %69, %103 : vector<8x32xf32>
    %c0_45 = arith.constant 0 : index
    %c0_46 = arith.constant 0 : index
    %c0_47 = arith.constant 0 : index
    %105 = vector.load %arg12[%c0_45, %c0_46, %c0_47] : memref<1x8x32xf32, #tpu.memory_space<vmem>>, vector<1x8x32xf32>
    %106 = vector.shape_cast %105 : vector<1x8x32xf32> to vector<8x32xf32>
    %107 = vector.shape_cast %104 : vector<8x32xf32> to vector<1x8x32xf32>
    tpu.vector_store %arg12[%c0_45, %c0_46, %c0_47], %107 {strides = array<i32>} : memref<1x8x32xf32, #tpu.memory_space<vmem>>, vector<1x8x32xf32>,
    return
  }
  func.func @transform_0(%arg0: i32) -> (i32, i32, i32) {
    %c0_i32 = arith.constant 0 : i32
    %c0_i32_0 = arith.constant 0 : i32
    %c0_i32_1 = arith.constant 0 : i32
    return %arg0, %c0_i32, %c0_i32_0 : i32, i32, i32
  }
  func.func @transform_1(%arg0: i32) -> (i32, i32) {
    %c0_i32 = arith.constant 0 : i32
    %c0_i32_0 = arith.constant 0 : i32
    %c0_i32_1 = arith.constant 0 : i32
    return %c0_i32, %c0_i32_0 : i32, i32
  }
  func.func @transform_2(%arg0: i32) -> (i32, i32) {
    %c0_i32 = arith.constant 0 : i32
    %c0_i32_0 = arith.constant 0 : i32
    %c0_i32_1 = arith.constant 0 : i32
    return %c0_i32, %c0_i32_0 : i32, i32
  }
  func.func @transform_3(%arg0: i32) -> (i32, i32) {
    %c0_i32 = arith.constant 0 : i32
    %c0_i32_0 = arith.constant 0 : i32
    %c0_i32_1 = arith.constant 0 : i32
    return %c0_i32, %c0_i32_0 : i32, i32
  }
  func.func @transform_4(%arg0: i32) -> (i32, i32) {
    %c0_i32 = arith.constant 0 : i32
    %c0_i32_0 = arith.constant 0 : i32
    %c0_i32_1 = arith.constant 0 : i32
    return %c0_i32, %c0_i32_0 : i32, i32
  }
  func.func @transform_5(%arg0: i32) -> (i32, i32) {
    %c0_i32 = arith.constant 0 : i32
    %c0_i32_0 = arith.constant 0 : i32
    %c0_i32_1 = arith.constant 0 : i32
    return %c0_i32, %c0_i32_0 : i32, i32
  }
  func.func @transform_6(%arg0: i32) -> (i32, i32) {
    %c0_i32 = arith.constant 0 : i32
    %c0_i32_0 = arith.constant 0 : i32
    %c0_i32_1 = arith.constant 0 : i32
    return %c0_i32, %c0_i32_0 : i32, i32
  }
  func.func @transform_7(%arg0: i32) -> (i32, i32) {
    %c0_i32 = arith.constant 0 : i32
    %c0_i32_0 = arith.constant 0 : i32
    %c0_i32_1 = arith.constant 0 : i32
    return %c0_i32, %c0_i32_0 : i32, i32
  }
  func.func @transform_8(%arg0: i32) -> (i32, i32) {
    %c0_i32 = arith.constant 0 : i32
    %c0_i32_0 = arith.constant 0 : i32
    %c0_i32_1 = arith.constant 0 : i32
    return %c0_i32, %c0_i32_0 : i32, i32
  }
  func.func @transform_9(%arg0: i32) -> (i32, i32) {
    %c0_i32 = arith.constant 0 : i32
    %c0_i32_0 = arith.constant 0 : i32
    %c0_i32_1 = arith.constant 0 : i32
    return %c0_i32, %c0_i32_0 : i32, i32
  }
  func.func @transform_10(%arg0: i32) -> (i32, i32) {
    %c0_i32 = arith.constant 0 : i32
    %c0_i32_0 = arith.constant 0 : i32
    %c0_i32_1 = arith.constant 0 : i32
    return %c0_i32, %c0_i32_0 : i32, i32
  }
  func.func @transform_11(%arg0: i32) -> (i32, i32, i32) {
    %c0_i32 = arith.constant 0 : i32
    %c0_i32_0 = arith.constant 0 : i32
    %c0_i32_1 = arith.constant 0 : i32
    return %arg0, %c0_i32, %c0_i32_0 : i32, i32, i32
  }
}

</mosaic_0001>

<bundles_post_ra>
// kernel: tpu_custom_call.1
= control target key start
LH: loop header
LB: loop body
LE: loop exit
PB: predicated region body
PF: predicated region fallthrough
CT: control target
= control target key end

     0   :  { %16 = vsyncpa [#allocation3], 0  ;;  %s3275_s0 = inlined_call_operand.hbm [shape: f32[2,8,32], index: 0, kind: input, shape index: {}]   ;;  %s3276_s1 = inlined_call_operand.vmem [shape: f32[1,32], index: 1, kind: input, shape index: {}]   ;;  %s3277_s2 = inlined_call_operand.vmem [shape: f32[1,32], index: 2, kind: input, shape index: {}]   ;;  %s3278_s3 = inlined_call_operand.vmem [shape: f32[1,32], index: 3, kind: input, shape index: {}]   ;;  %s3279_s4 = inlined_call_operand.vmem [shape: f32[1,32], index: 4, kind: input, shape index: {}]   ;;  %s3280_s5 = inlined_call_operand.vmem [shape: f32[32,32], index: 5, kind: input, shape index: {}]   ;;  %s3281_s6 = inlined_call_operand.vmem [shape: f32[32,32], index: 6, kind: input, shape index: {}]   ;;  %s3282_s7 = inlined_call_operand.vmem [shape: f32[32,32], index: 7, kind: input, shape index: {}]   ;;  %s3283_s8 = inlined_call_operand.vmem [shape: f32[32,32], index: 8, kind: input, shape index: {}]   ;;  %s3284_s9 = inlined_call_operand.vmem [shape: f32[32,128], index: 9, kind: input, shape index: {}]   ;;  %s3285_s10 = inlined_call_operand.vmem [shape: f32[128,32], index: 10, kind: input, shape index: {}]   ;;  %s3286_s11 = inlined_call_operand.hbm [shape: f32[2,8,32], index: 11, kind: output, shape index: {}]  }
   0x1   :  { %18 = vsyncpa [#allocation3 + $0x1], 0 }
   0x2   :  { %19 = vsyncpa [#allocation4], 0 }
   0x3   :  { %21 = vsyncpa [#allocation4 + $0x1], 0  ;;  %s2788_s17 = smov 0   ;;  %s2790_s18 = smov 0  }
   0x4   :  { %s2792_s19 = smov 0   ;;  %s2794_s20 = smov 0  }
   0x5 LB: > { %3289 = sst [smem:[#allocation8_spill]] %s2708_s19  ;;  %s2809_s21 = sadd.s32 4294967295, %s2712_s20   ;;  %s2712_s20 = sphi %s2794_s20, %s3305_s20   ;;  %s2708_s19 = sphi %s2792_s19, %s3302_s19   ;;  %s2704_s18 = sphi %s2790_s18, %s3304_s18   ;;  %s2700_s17 = sphi %s2788_s17, %s3303_s17  }
   0x6   : > { %s2255_s22 = sadd.s32 4294967294, %s2712_s20   ;;  %s2813_s23 = sadd.s32 1, %s2712_s20  }
   0x7   : > { %s34_s24 = sadd.s32 1, %s2708_s19  ;;  %s31_s25 = ssub.s32 %s2712_s20, %s2813_s23 }
   0x8   : > { %p41_p0 = scmp.ne.s32.totalorder %s2708_s19, %s2704_s18  ;;  %p32_p1 = scmp.eq.s32.totalorder %s31_s25, 0 }
   0x9   : > { %p42_p2 = scmp.eq.s32.totalorder %s2712_s20, 0  ;;  %p47_p3 = scmp.ne.s32.totalorder %s2704_s18, %s2700_s17 }
   0xa   : > { %p48_p4 = scmp.eq.s32.totalorder %s2809_s21, 0  ;;  %p281_p7 = scmp.eq.s32.totalorder %s2809_s21, 1 }
   0xb   : > { %s2825_s26 = scalar_select %p32_p1, %s2708_s19, %s34_s24  }
   0xc   : > { %p2827_p5 = por %p42_p2, %p41_p0  ;;  %p2831_p6 = por %p48_p4, %p47_p3 }
   0xd   : > { %3290 = sst [smem:[#allocation9_spill]] %s2825_s26  ;;  %p287_p8 = scmp.eq.s32.totalorder %s2255_s22, 1 }
   0xe   : > { %p2550_p10 = scmp.lt.s32.totalorder %s2712_s20, 2  ;;  %p2838_p11 = por %p281_p7, %p41_p0 }
   0xf   : > { %p2842_p12 = por %p287_p8, %p47_p3  ;;  %s337_s12 = sand.u32 1, %s2708_s19  }
  0x10   : > { %s3293_s29 = scalar_select %p2838_p11, 1, 0 }
  0x11   : > { %s3294_s30 = scalar_select %p2842_p12, 1, 0 }
  0x12   : > { %s2259_s13 = sshll.u32 %s2712_s20, 7  ;;  %s2258_s14 = sshll.u32 %s337_s12, 3 }
  0x13   : > { %s2851_s24 = scalar_lea.hbm %s3275_s0, %s2259_s13  ;;  %s341_s22 = scalar_lea.vmem [#allocation2], %s2258_s14 }
  0x14   : > { %s348_s25 = sshll.u32 %s341_s22, 4  ;;  %p2855_p13 = pnand %p2550_p10, %p2827_p5  ;;  %s2859_s25 = int_to_ptr.vmem [resolvable:$true] %s348_s25 }
  0x15   : > { %s338_s15 = scalar_lea.sflag [#allocation3], %s337_s12  ;;  %s2616_s13 = scalar_lea.hbm %s2851_s24, 128 }
  0x16   : > { %p2617_p2 = scmp.ne.s32.totalorder %s2851_s24, %s2616_s13  ;;  %p2618_p3 = pneg %p2855_p13 }
  0x17   : > { %s2621_s16 = scalar_lea.hbm %s3275_s0, 256  ;;  %p2622_p5 = scmp.lt.u32.totalorder %s2851_s24, %s3275_s0 }
  0x18   : > { %p2619_p4 = pnand %p2618_p3, %p2617_p2  ;;  %p2623_p8 = scmp.lt.u32.totalorder %s2621_s16, %s2616_s13 }
  0x19   : > { %p2625_p9 = scmp.lt.u32.totalorder %s2616_s13, %s2851_s24 }
  0x1a   : > { %p2620_p7 = pneg %p2619_p4  ;;  %p2624_p10 = por %p2623_p8, %p2622_p5 }
  0x1c   : > { %p2626_p0 = por %p2625_p9, %p2624_p10 }
  0x1e   : > { %p2627_p1 = pnand %p2626_p0, %p2620_p7 }
  0x20   : > { %2630 = shalt.err (!%p2627_p1)
}
  0x21   : > { %s2631_s12 = scalar_lea.vmem %s2859_s25, 128  ;;  %s2714_s27 = smov [#allocation2]  }
  0x22   : > { %p2632_p2 = scmp.ne.s32.totalorder %s2859_s25, %s2631_s12  ;;  %s2636_s14 = sshll.u32 %s2714_s27, 4  ;;  %s2637_s14 = int_to_ptr.vmem [resolvable:$false] %s2636_s14 }
  0x23   : > { %s2638_s19 = scalar_lea.vmem %s2637_s14, 256  ;;  %p2639_p11 = scmp.lt.s32.totalorder %s2859_s25, %s2637_s14 }
  0x24   : > { %p2634_p4 = pnand %p2632_p2, %p2618_p3  ;;  %p2640_p5 = scmp.lt.s32.totalorder %s2638_s19, %s2631_s12 }
  0x26   : > { %p2635_p12 = pneg %p2634_p4  ;;  %p2641_p8 = por %p2640_p5, %p2639_p11 }
  0x28   : > { %p2642_p9 = pnand %p2641_p8, %p2635_p12 }
  0x2a   : > { %2645 = shalt.err (!%p2642_p9)
}
  0x2b   : > { %2545 = dma.hbm_to_vmem [thread:$0]  (!%p2855_p13), %s2851_s24, 128, %s2859_s25, %s338_s15  }
  0x2c   : > { %p3296_p0 = scmp.lt.s32.totalorder %s2712_s20, 3  ;;  %p3297_p1 = scmp.ge.s32.totalorder %s2712_s20, 1 }
  0x2e   : > { %p354_p3 = pnand %p3297_p1, %p3296_p0 }
  0x2f   : > { %s2893_s13 = sand.u32 (!%p354_p3), 1, %s2704_s18  }
  0x30   : > { %357 = sbr.rel (%p354_p3) target bundleno = 2609 (0xa31), region = 64  ;;  %s2261_s16 = sshll.u32 (!%p354_p3), %s2893_s13, 3 }
  0x31   : > { %s360_s22 = scalar_lea.sflag (!%p354_p3), [#allocation3], %s2893_s13  ;;  %s363_s26 = scalar_lea.vmem (!%p354_p3), [#allocation2], %s2261_s16 }
  0x37   : > { %2691 = dma.done.wait (%p2831_p6), %s360_s22, 128  }
  0x38   : > { %2693 = vsyncadd (%p2831_p6), %s360_s22, 4294967168  ;;  %vm405_vm0 = vcmask 261120   ;;  %v2903_v0 = vld [vmem:[%s363_s26] sm:$0xff]  ;;  %v436_v9 = vld [vmem:[%s3280_s5 + $0x10] sm:$0xff]  ;;  %v2715_v10 = vmov 0.0|0.0   ;;  %vm2716_vm1 = vmmov 0   ;;  %v675_v43 = vlaneseq }
  0x39   : > { %v406_v1 = vsel %vm405_vm0, %v2903_v0, 0.0  ;;  %v434_v7 = vld [vmem:[%s3280_s5] sm:$0xff]  ;;  %v435_v8 = vld [vmem:[%s3280_s5 + $0x8] sm:$0xff]  ;;  %2484 = vmatprep.subr.bf16.mxu1 %v2715_v10  ;;  %v437_v12 = vld [vmem:[%s3280_s5 + $0x18] sm:$0xff]  ;;  %v2717_v13 = vmov 0.0   ;;  %s2718_s22 = smov 104  }
  0x3a   : > { %407 = vadd.xlane.f32.xlu0 %v406_v1  ;;  %v2485_v11 = vpack.c.bf16 %v435_v8, %v434_v7  ;;  %2362 = vmatprep.mubr.msk.f32.mxu1 %vm2716_vm1, %v2717_v13  ;;  %v2488_v14 = vpack.c.bf16 %v437_v12, %v436_v9  ;;  %v2263_v19 = vld [vmem:[%s3276_s1] ss:$0 sm:$0xff]  ;;  %v512_v22 = vld [vmem:[%s3281_s6 + $0x8] sm:$0xff]  ;;  %v513_v27 = vld [vmem:[%s3281_s6 + $0x10] sm:$0xff]  ;;  %s2719_s26 = smov 120   ;;  %s2720_s24 = smov 112  }
  0x3b   : > { %2397 = vmatprep.subr.mxu0 %v2717_v13  ;;  %2399 = vmatprep.mubr.msk.f32.mxu0 %vm2716_vm1, %v2717_v13  ;;  %v511_v21 = vld [vmem:[%s3281_s6] sm:$0xff]  ;;  %v514_v28 = vld [vmem:[%s3281_s6 + $0x18] sm:$0xff]  ;;  %v586_v31 = vld [vmem:[%s3282_s7 + $0x8] sm:$0xff]  ;;  %v2980_v44 = vshrl.u32 %v675_v43, 7  ;;  %v2982_v45 = vand.u32 127, %v675_v43  ;;  %vm1104_vm3 = vcmask 64512  }
  0x3c   : > { %2486 = vmatpush3.bf16.msra.mxu1 %v2485_v11  ;;  %v2264_v23 = vld [vmem:[%s3277_s2] ss:$0 sm:$0xff]  ;;  %v2491_v25 = vpack.c.bf16 %v512_v22, %v511_v21  ;;  %v2494_v29 = vpack.c.bf16 %v514_v28, %v513_v27  ;;  %v587_v33 = vld [vmem:[%s3282_s7 + $0x10] sm:$0xff]  ;;  %v588_v34 = vld [vmem:[%s3282_s7 + $0x18] sm:$0xff]  ;;  %v2721_v46 = vmov 1983009808  }
  0x3d   : > { %2487 = vmatprep.subr.bf16.mxu1 %v2715_v10  ;;  %v585_v30 = vld [vmem:[%s3282_s7] sm:$0xff]  ;;  %v2500_v35 = vpack.c.bf16 %v588_v34, %v587_v33  ;;  %vm1102_vm2 = vcmp.ge.s32.totalorder %v2980_v44, %v2982_v45  ;;  %v673_v47 = vunpack.c.l.s4 %v2721_v46  ;;  %v2722_v48 = vmov 1934713408   ;;  %s2726_s25 = smov 24   ;;  %s2293_s14 = sshll.u32 %s2809_s21, 7 }
  0x3e   : > { %v2497_v32 = vpack.c.bf16 %v586_v31, %v585_v30  ;;  %v705_v49 = vunpack.c.l.s4 %v2722_v48  ;;  %vm1894_vm4 = vcmask 130048   ;;  %vm1896_vm5 = vcmask 195584   ;;  %s401_s19 = scalar_lea.vmem [#allocation5], %s2261_s16  ;;  %s2172_s21 = scalar_lea.sflag [#allocation4], %s2893_s13 }
  0x3f   : > { %v674_v50 = vunpack.c.0.s8 %v673_v47  ;;  %p3298_p11 = scmp.ne.s32.totalorder %s3293_s29, 0  ;;  %s2727_s16 = smov [#allocation5]  }
  0x40   : > { %2489 = vmatpush3.bf16.msra.mxu1 %v2488_v14  ;;  %v706_v53 = vunpack.c.0.s8 %v705_v49  ;;  %s2650_s15 = sshll.u32 %s2727_s16, 4  ;;  %s2651_s15 = int_to_ptr.vmem [resolvable:$false] %s2650_s15 }
  0x41   : > { %2490 = vmatprep.subr.bf16.mxu1 %v2715_v10  ;;  %v2987_v54 = vsub.s32 %v674_v50, %v2980_v44  ;;  %s2652_s12 = scalar_lea.vmem %s2651_s15, 256 }
  0x42   : > { %v2990_v60 = vsub.s32 %v706_v53, %v2980_v44 }
  0xc7   : > { %v408_v2 = vpop.xlane.xlu0 %407 }
  0xc8   : > { %v410_v3 = vmul.f32 0.03125, %v408_v2 }
  0xca   : > { %v411_v4 = vsub.f32 %v2903_v0, %v410_v3 }
  0xcc   : > { %v412_v5 = vmul.f32 %v411_v4, %v411_v4 }
  0xce   : > { %v413_v6 = vsel %vm405_vm0, %v412_v5, 0.0 }
  0xcf   : > { %414 = vadd.xlane.f32.xlu0 %v413_v6 }
 0x15c   : > { %v415_v15 = vpop.xlane.xlu0 %414 }
 0x15d   : > { %v416_v16 = vmul.f32 0.03125, %v415_v15 }
 0x15f   : > { %v417_v17 = vadd.f32 1e-05, %v416_v16 }
 0x161   : > { %2596 = vrsqrt.f32 %v417_v17 }
 0x16b   : > { %v2597_v18 = vpop.eup %2596 }
 0x16c   : > { %v419_v20 = vmul.f32 %v2597_v18, %v411_v4 }
 0x16e   : > { %v426_v24 = vmul.f32 %v2263_v19, %v419_v20 }
 0x170   : > { %v433_v26 = vadd.f32 %v2264_v23, %v426_v24 }
 0x172   : > { %2363 = vmatmul.mubr.msk.f32.vlgmr.msra.gmra.mrb[0].mxu1 %vm405_vm0, %v433_v26 }
 0x173   : > { %2492 = vmatpush3.bf16.msra.mxu1 %v2491_v25  ;;  %2373 = vmatprep.mubr.msk.f32.mxu1 %vm2716_vm1, %v2717_v13 }
 0x174   : > { %2493 = vmatprep.subr.bf16.mxu1 %v2715_v10 }
 0x177   : > { %2495 = vmatpush3.bf16.msra.mxu1 %v2494_v29 }
 0x178   : > { %2496 = vmatprep.subr.bf16.mxu1 %v2715_v10 }
 0x17a   : > { %2374 = vmatmul.mubr.msk.f32.vlgmr.msra.gmra.mrb[2].mxu1 %vm405_vm0, %v433_v26 }
 0x17b   : > { %2498 = vmatpush3.bf16.msra.mxu1 %v2497_v32  ;;  %2384 = vmatprep.mubr.msk.f32.mxu1 %vm2716_vm1, %v2717_v13 }
 0x17c   : > { %2499 = vmatprep.subr.bf16.mxu1 %v2715_v10 }
 0x17f   : > { %2501 = vmatpush3.bf16.msra.mxu1 %v2500_v35 }
 0x180   : > { %2387 = vmatprep.subr.mxu1 %v2717_v13 }
 0x182   : > { %2385 = vmatmul.mubr.msk.f32.vlgmr.msra.gmra.mrb[4].mxu1 %vm405_vm0, %v433_v26 }
 0x183   : > { %2389 = vmatprep.mubr.msk.f32.mxu1 %vm2716_vm1, %v2717_v13 }
 0x245   : > { %v507_v36 = vpop.f32.mrb[0].mxu1 }
 0x246   : > { %v2364_v37 = vpop.f32.mrb[1].mxu1  ;;  %v659_v40 = vmul.f32 0.35355338, %v507_v36 }
 0x24d   : > { %v581_v38 = vpop.f32.mrb[2].mxu1 }
 0x24e   : > { %813 = vrot.lane.b32.xlu0 %v581_v38, %s2718_s22  ;;  %807 = vrot.lane.b32.xlu1 %v581_v38, %s2719_s26  ;;  %v2375_v39 = vpop.f32.mrb[3].mxu1 }
 0x252   : > { %810 = vrot.lane.b32.xlu1 %v581_v38, %s2720_s24 }
 0x255   : > { %v2975_v41 = vpop.f32.mrb[4].mxu1 }
 0x256   : > { %661 = vrot.lane.b32.xlu1 %v659_v40, %s2719_s26  ;;  %v2386_v42 = vpop.f32.mrb[5].mxu1 }
 0x25a   : > { %664 = vrot.lane.b32.xlu1 %v659_v40, %s2720_s24 }
 0x25e   : > { %667 = vrot.lane.b32.xlu1 %v659_v40, %s2718_s22 }
 0x2c0   : > { %v814_v51 = vpop.permute.xlu0 %813  ;;  %v808_v52 = vpop.permute.xlu1 %807 }
 0x2c1   : > { %v832_v55 = vcombine.low %v808_v52, %v814_v51  ;;  %v833_v56 = vcombine.high %v808_v52, %v814_v51 }
 0x2c3   : > { %v840_v61 = vrot.slane %v832_v55, %v2987_v54  ;;  %v847_v62 = vrot.slane %v833_v56, %v2987_v54 }
 0x2c4   : > { %v811_v57 = vpop.permute.xlu1 %810 }
 0x2c5   : > { %v816_v58 = vcombine.low %v581_v38, %v811_v57  ;;  %v817_v59 = vcombine.high %v581_v38, %v811_v57 }
 0x2c7   : > { %v824_v63 = vrot.slane %v816_v58, %v2987_v54  ;;  %v831_v1 = vrot.slane %v817_v59, %v2987_v54 }
 0x2c8   : > { %v662_v2 = vpop.permute.xlu1 %661 }
 0x2c9   : > { %v848_v3 = vcombine.low %v824_v63, %v840_v61  ;;  %v849_v4 = vcombine.high %v824_v63, %v840_v61  ;;  %v864_v5 = vcombine.low %v831_v1, %v847_v62  ;;  %v865_v6 = vcombine.high %v831_v1, %v847_v62 }
 0x2cb   : > { %v856_v7 = vrot.slane %v848_v3, %v2990_v60  ;;  %v863_v8 = vrot.slane %v849_v4, %v2990_v60  ;;  %v872_v9 = vrot.slane %v864_v5, %v2990_v60  ;;  %v879_v11 = vrot.slane %v865_v6, %v2990_v60 }
 0x2cc   : > { %v665_v12 = vpop.permute.xlu1 %664 }
 0x2cd   : > { %v884_v14 = vcombine.low %v856_v7, %v863_v8  ;;  %v2270_v15 = vcombine.high %v856_v7, %v863_v8  ;;  %v900_v16 = vcombine.low %v872_v9, %v879_v11  ;;  %v2271_v17 = vcombine.high %v872_v9, %v879_v11 }
 0x2ce   : > { %v670_v18 = vcombine.low %v659_v40, %v665_v12  ;;  %v671_v19 = vcombine.high %v659_v40, %v665_v12 }
 0x2cf   : > { %v891_v20 = vrot.slane %v884_v14, %v2987_v54  ;;  %v899_v21 = vrot.slane %v2270_v15, %v2987_v54  ;;  %v907_v22 = vrot.slane %v900_v16, %v2987_v54  ;;  %v915_v23 = vrot.slane %v2271_v17, %v2987_v54 }
 0x2d0   : > { %v668_v24 = vpop.permute.xlu1 %667  ;;  %v678_v29 = vrot.slane %v670_v18, %v2987_v54  ;;  %v685_v30 = vrot.slane %v671_v19, %v2987_v54  ;;  %v2723_v15 = vmov -1e+30  }
 0x2d1   : > { %v916_v25 = vcombine.low %v891_v20, %v899_v21  ;;  %v932_v26 = vcombine.low %v907_v22, %v915_v23  ;;  %v686_v27 = vcombine.low %v662_v2, %v668_v24  ;;  %v687_v28 = vcombine.high %v662_v2, %v668_v24 }
 0x2d2   : > { %v917_v31 = vcombine.high %v891_v20, %v899_v21  ;;  %v933_v32 = vcombine.high %v907_v22, %v915_v23  ;;  %v1103_v16 = vsel %vm1102_vm2, 0.0, %v2723_v15 }
 0x2d3   : > { %v694_v33 = vrot.slane %v686_v27, %v2987_v54  ;;  %v701_v34 = vrot.slane %v687_v28, %v2987_v54  ;;  %v924_v35 = vrot.slane %v916_v25, %v2990_v60  ;;  %v940_v36 = vrot.slane %v932_v26, %v2990_v60 }
 0x2d4   : > { %v931_v37 = vrot.slane %v917_v31, %v2990_v60  ;;  %v947_v38 = vrot.slane %v933_v32, %v2990_v60 }
 0x2d5   : > { %v702_v39 = vcombine.low %v678_v29, %v694_v33  ;;  %v703_v40 = vcombine.high %v678_v29, %v694_v33  ;;  %v718_v42 = vcombine.low %v685_v30, %v701_v34  ;;  %v719_v43 = vcombine.high %v685_v30, %v701_v34 }
 0x2d6   : > { %v948_v46 = vcombine.low %v924_v35, %v940_v36  ;;  %v950_v47 = vcombine.low %v931_v37, %v947_v38  ;;  %v949_v9 = vcombine.high %v924_v35, %v940_v36  ;;  %v951_v12 = vcombine.high %v931_v37, %v947_v38 }
 0x2d7   : > { %v710_v48 = vrot.slane %v702_v39, %v2990_v60  ;;  %v717_v49 = vrot.slane %v703_v40, %v2990_v60  ;;  %v726_v50 = vrot.slane %v718_v42, %v2990_v60  ;;  %v733_v51 = vrot.slane %v719_v43, %v2990_v60 }
 0x2d8   : > { %2388 = vmatpush3.xpose.msk.msra.mxu1 %vm1104_vm3, %v948_v46  ;;  %2398 = vmatpush3.xpose.msk.msra.mxu0 %vm1104_vm3, %v950_v47 }
 0x2d9   : > { %v738_v52 = vcombine.low %v710_v48, %v717_v49  ;;  %v2268_v53 = vcombine.high %v710_v48, %v717_v49  ;;  %v754_v55 = vcombine.low %v726_v50, %v733_v51  ;;  %v2269_v56 = vcombine.high %v726_v50, %v733_v51  ;;  %2392 = vmatprep.subr.mxu1 %v2717_v13 }
 0x2da   : > { %2407 = vmatprep.subr.mxu0 %v2717_v13 }
 0x2db   : > { %v745_v57 = vrot.slane %v738_v52, %v2987_v54  ;;  %v753_v58 = vrot.slane %v2268_v53, %v2987_v54  ;;  %v761_v59 = vrot.slane %v754_v55, %v2987_v54  ;;  %v769_v61 = vrot.slane %v2269_v56, %v2987_v54 }
 0x2dd   : > { %v770_v62 = vcombine.low %v745_v57, %v753_v58  ;;  %v786_v63 = vcombine.low %v761_v59, %v769_v61  ;;  %v771_v1 = vcombine.high %v745_v57, %v753_v58  ;;  %v787_v2 = vcombine.high %v761_v59, %v769_v61 }
 0x2df   : > { %v778_v3 = vrot.slane %v770_v62, %v2990_v60  ;;  %v794_v4 = vrot.slane %v786_v63, %v2990_v60  ;;  %v785_v5 = vrot.slane %v771_v1, %v2990_v60  ;;  %v801_v6 = vrot.slane %v787_v2, %v2990_v60 }
 0x2e1   : > { %v802_v7 = vcombine.low %v778_v3, %v794_v4  ;;  %v804_v8 = vcombine.low %v785_v5, %v801_v6  ;;  %v803_v11 = vcombine.high %v778_v3, %v794_v4  ;;  %v805_v14 = vcombine.high %v785_v5, %v801_v6 }
 0x2e3   : > { %2390 = vmatmul.mubr.msk.f32.vlgmr.msra.gmra.mrb[6].mxu1 %vm1104_vm3, %v802_v7  ;;  %2400 = vmatmul.mubr.msk.f32.vlgmr.msra.gmra.mrb[0].mxu0 %vm1104_vm3, %v804_v8 }
 0x2e4   : > { %2393 = vmatpush3.xpose.msk.msra.mxu1 %vm1104_vm3, %v949_v9  ;;  %2394 = vmatprep.mubr.msk.f32.mxu1 %vm2716_vm1, %v2717_v13 }
 0x2e5   : > { %2402 = vmatprep.subr.mxu1 %v2717_v13  ;;  %2409 = vmatprep.mubr.msk.f32.mxu0 %vm2716_vm1, %v2717_v13 }
 0x2e7   : > { %2395 = vmatmul.mubr.msk.f32.vlgmr.msra.gmra.mrb[8].mxu1 %vm1104_vm3, %v803_v11 }
 0x2e8   : > { %2403 = vmatpush3.xpose.msk.msra.mxu1 %vm1104_vm3, %v951_v12  ;;  %2404 = vmatprep.mubr.msk.f32.mxu1 %vm2716_vm1, %v2717_v13 }
 0x2e9   : > { %2412 = vmatprep.subr.mxu1 %v2717_v13 }
 0x2eb   : > { %2405 = vmatmul.mubr.msk.f32.vlgmr.msra.gmra.mrb[10].mxu1 %vm1104_vm3, %v805_v14 }
 0x2ec   : > { %2414 = vmatprep.mubr.msk.f32.mxu1 %vm2716_vm1, %v2717_v13 }
 0x3b6   : > { %v1177_v17 = vpop.f32.mrb[6].mxu1  ;;  %v1329_v18 = vpop.f32.mrb[0].mxu0 }
 0x3b7   : > { %v1178_v19 = vadd.f32 %v1177_v17, %v1103_v16  ;;  %v1330_v20 = vadd.f32 %v1329_v18, %v1103_v16  ;;  %v2391_v21 = vpop.f32.mrb[7].mxu1  ;;  %v2401_v22 = vpop.f32.mrb[1].mxu0 }
 0x3b9   : > { %v1409_v23 = vsel %vm1104_vm3, %v1178_v19, -inf  ;;  %v1415_v27 = vsel %vm1104_vm3, %v1330_v20, -inf }
 0x3ba   : > { %1410 = vmax.xlane.f32.xlu1 %v1409_v23  ;;  %v1253_v24 = vpop.f32.mrb[8].mxu1 }
 0x3bb   : > { %v1254_v25 = vadd.f32 %v1253_v24, %v1103_v16  ;;  %v2396_v26 = vpop.f32.mrb[9].mxu1 }
 0x3bd   : > { %v1412_v28 = vsel %vm1104_vm3, %v1254_v25, -inf }
 0x3be   : > { %1416 = vmax.xlane.f32.xlu1 %v1415_v27  ;;  %1413 = vmax.xlane.f32.xlu0 %v1412_v28  ;;  %v1405_v44 = vpop.f32.mrb[10].mxu1 }
 0x3bf   : > { %v1406_v45 = vadd.f32 %v1405_v44, %v1103_v16  ;;  %v2406_v29 = vpop.f32.mrb[11].mxu1 }
 0x3c1   : > { %v1418_v30 = vsel %vm1104_vm3, %v1406_v45, -inf }
 0x3c2   : > { %1419 = vmax.xlane.f32.xlu1 %v1418_v30 }
 0x3d3   : > { %956 = vrot.lane.b32.xlu1 %v2975_v41, %s2720_s24  ;;  %s2725_s24 = smov 8  }
 0x447   : > { %v1411_v31 = vpop.xlane.xlu1 %1410 }
 0x448   : > { %v1421_v32 = vsub.f32 %v1178_v19, %v1411_v31 }
 0x44a   : > { %v1425_v33 = vmul.f32 1.442695, %v1421_v32 }
 0x44b   : > { %v1417_v34 = vpop.xlane.xlu1 %1416  ;;  %v1414_v35 = vpop.xlane.xlu0 %1413 }
 0x44c   : > { %2598 = vpow2.f32 %v1425_v33  ;;  %v1423_v36 = vsub.f32 %v1330_v20, %v1417_v34  ;;  %v1422_v37 = vsub.f32 %v1254_v25, %v1414_v35 }
 0x44e   : > { %v1429_v38 = vmul.f32 1.442695, %v1423_v36  ;;  %v1427_v39 = vmul.f32 1.442695, %v1422_v37 }
 0x44f   : > { %v1420_v40 = vpop.xlane.xlu1 %1419 }
 0x450   : > { %2600 = vpow2.f32 %v1429_v38  ;;  %v1424_v42 = vsub.f32 %v1406_v45, %v1420_v40 }
 0x451   : > { %2602 = vpow2.f32 %v1427_v39 }
 0x452   : > { %v1431_v43 = vmul.f32 1.442695, %v1424_v42 }
 0x453   : > { %v957_v55 = vpop.permute.xlu1 %956 }
 0x454   : > { %2604 = vpow2.f32 %v1431_v43  ;;  %v962_v61 = vcombine.low %v2975_v41, %v957_v55  ;;  %v963_v62 = vcombine.high %v2975_v41, %v957_v55 }
 0x456   : > { %v3053_v46 = vpop.eup %2598  ;;  %v970_v4 = vrot.slane %v962_v61, %v2987_v54  ;;  %v977_v5 = vrot.slane %v963_v62, %v2987_v54 }
 0x457   : > { %v1433_v47 = vsel %vm1104_vm3, %v3053_v46, 0.0 }
 0x458   : > { %1434 = vadd.xlane.f32.xlu0 %v1433_v47  ;;  %v1899_v47 = vld [vmem:[%s3283_s8 + $0x8] sm:$0xff] }
 0x45a   : > { %v3057_v48 = vpop.eup %2600 }
 0x45b   : > { %v2603_v49 = vpop.eup %2602  ;;  %v1439_v50 = vsel %vm1104_vm3, %v3057_v48, 0.0 }
 0x45c   : > { %1440 = vadd.xlane.f32.xlu0 %v1439_v50  ;;  %v1436_v51 = vsel %vm1104_vm3, %v2603_v49, 0.0 }
 0x45d   : > { %1437 = vadd.xlane.f32.xlu1 %v1436_v51 }
 0x45e   : > { %v3062_v52 = vpop.eup %2604 }
 0x45f   : > { %v1442_v53 = vsel %vm1104_vm3, %v3062_v52, 0.0 }
 0x461   : > { %1443 = vadd.xlane.f32.xlu1 %v1442_v53 }
 0x472   : > { %959 = vrot.lane.b32.xlu1 %v2975_v41, %s2718_s22  ;;  %953 = vrot.lane.b32.xlu0 %v2975_v41, %s2719_s26  ;;  %s2724_s26 = smov 16   ;;  %s2185_s22 = sshll.u32 %s401_s19, 4  ;;  %s3232_s22 = int_to_ptr.vmem [resolvable:$true] %s2185_s22 }
 0x473   : > { %s2646_s28 = scalar_lea.vmem %s3232_s22, 128  ;;  %p2653_p7 = scmp.lt.s32.totalorder %s3232_s22, %s2651_s15 }
 0x474   : > { %p2647_p6 = scmp.ne.s32.totalorder %s3232_s22, %s2646_s28  ;;  %p2654_p10 = scmp.lt.s32.totalorder %s2652_s12, %s2646_s28 }
 0x476   : > { %p2648_p12 = pnand %p2647_p6, %p3298_p11  ;;  %p2655_p2 = por %p2654_p10, %p2653_p7 }
 0x478   : > { %p2649_p13 = pneg %p2648_p12 }
 0x47a   : > { %p2656_p4 = pnand %p2655_p2, %p2649_p13 }
 0x4e5   : > { %v1435_v56 = vpop.xlane.xlu0 %1434 }
 0x4e6   : > { %2606 = vrcp.f32 %v1435_v56 }
 0x4e9   : > { %v1441_v58 = vpop.xlane.xlu0 %1440 }
 0x4ea   : > { %v1438_v57 = vpop.xlane.xlu1 %1437 }
 0x4eb   : > { %2608 = vrcp.f32 %v1438_v57 }
 0x4ec   : > { %2610 = vrcp.f32 %v1441_v58 }
 0x4ed   : > { %v954_v63 = vpop.permute.xlu0 %953 }
 0x4ee   : > { %v1444_v59 = vpop.xlane.xlu1 %1443 }
 0x4ef   : > { %2612 = vrcp.f32 %v1444_v59 }
 0x4f0   : > { %v2607_v25 = vpop.eup %2606 }
 0x4f1   : > { %v1449_v37 = vmul.f32 %v2607_v25, %v3053_v46  ;;  %v1898_v46 = vld [vmem:[%s3283_s8] sm:$0xff] }
 0x4f2   : > { %v960_v1 = vpop.permute.xlu1 %959 }
 0x4f3   : > { %v978_v2 = vcombine.low %v954_v63, %v960_v1  ;;  %v979_v3 = vcombine.high %v954_v63, %v960_v1 }
 0x4f5   : > { %v986_v6 = vrot.slane %v978_v2, %v2987_v54  ;;  %v993_v7 = vrot.slane %v979_v3, %v2987_v54  ;;  %v2609_v45 = vpop.eup %2608 }
 0x4f6   : > { %v2611_v31 = vpop.eup %2610  ;;  %v1450_v38 = vmul.f32 %v2609_v45, %v2603_v49 }
 0x4f7   : > { %v994_v8 = vcombine.low %v970_v4, %v986_v6  ;;  %v995_v9 = vcombine.high %v970_v4, %v986_v6  ;;  %v1010_v11 = vcombine.low %v977_v5, %v993_v7  ;;  %v1011_v12 = vcombine.high %v977_v5, %v993_v7 }
 0x4f8   : > { %v1451_v42 = vmul.f32 %v2611_v31, %v3057_v48  ;;  %v2503_v48 = vpack.c.bf16 %v1899_v47, %v1898_v46 }
 0x4f9   : > { %v1002_v41 = vrot.slane %v994_v8, %v2990_v60  ;;  %v1009_v14 = vrot.slane %v995_v9, %v2990_v60  ;;  %v1018_v15 = vrot.slane %v1010_v11, %v2990_v60  ;;  %v1025_v16 = vrot.slane %v1011_v12, %v2990_v60  ;;  %v2613_v36 = vpop.eup %2612  ;;  %v1900_v8 = vld [vmem:[%s3283_s8 + $0x10] sm:$0xff]  ;;  %v1901_v9 = vld [vmem:[%s3283_s8 + $0x18] sm:$0xff] }
 0x4fa   : > { %v1452_v43 = vmul.f32 %v2613_v36, %v3062_v52 }
 0x4fb   : > { %v1030_v17 = vcombine.low %v1002_v41, %v1009_v14  ;;  %v2272_v18 = vcombine.high %v1002_v41, %v1009_v14  ;;  %v1046_v19 = vcombine.low %v1018_v15, %v1025_v16  ;;  %v2273_v20 = vcombine.high %v1018_v15, %v1025_v16 }
 0x4fc   : > { %v2506_v15 = vpack.c.bf16 %v1901_v9, %v1900_v8  ;;  %v2093_v8 = vld [vmem:[%s3285_s10 + $0x50] sm:$0xff]  ;;  %v2094_v9 = vld [vmem:[%s3285_s10 + $0x58] sm:$0xff] }
 0x4fd   : > { %v1037_v21 = vrot.slane %v1030_v17, %v2987_v54  ;;  %v1045_v22 = vrot.slane %v2272_v18, %v2987_v54  ;;  %v1053_v23 = vrot.slane %v1046_v19, %v2987_v54  ;;  %v1061_v24 = vrot.slane %v2273_v20, %v2987_v54 }
 0x4ff   : > { %v1062_v26 = vcombine.low %v1037_v21, %v1045_v22  ;;  %v1078_v27 = vcombine.low %v1053_v23, %v1061_v24  ;;  %v1063_v28 = vcombine.high %v1037_v21, %v1045_v22  ;;  %v1079_v44 = vcombine.high %v1053_v23, %v1061_v24 }
 0x501   : > { %v1070_v29 = vrot.slane %v1062_v26, %v2990_v60  ;;  %v1086_v30 = vrot.slane %v1078_v27, %v2990_v60  ;;  %v1077_v32 = vrot.slane %v1063_v28, %v2990_v60  ;;  %v1093_v33 = vrot.slane %v1079_v44, %v2990_v60 }
 0x503   : > { %v1094_v34 = vcombine.low %v1070_v29, %v1086_v30  ;;  %v1095_v35 = vcombine.high %v1070_v29, %v1086_v30  ;;  %v1096_v39 = vcombine.low %v1077_v32, %v1093_v33  ;;  %v1097_v40 = vcombine.high %v1077_v32, %v1093_v33 }
 0x505   : > { %2408 = vmatpush3.msra.mxu0 %v1094_v34  ;;  %2413 = vmatpush3.msra.mxu1 %v1095_v35 }
 0x506   : > { %2410 = vmatmul.mubr.msk.f32.vlgmr.msra.gmra.mrb[2].mxu0 %vm1104_vm3, %v1449_v37  ;;  %2415 = vmatmul.mubr.msk.f32.vlgmr.msra.gmra.mrb[12].mxu1 %vm1104_vm3, %v1450_v38 }
 0x507   : > { %2417 = vmatprep.subr.mxu0 %v2717_v13  ;;  %2422 = vmatprep.subr.mxu1 %v2717_v13 }
 0x508   : > { %2418 = vmatpush3.msra.mxu0 %v1096_v39  ;;  %2423 = vmatpush3.msra.mxu1 %v1097_v40 }
 0x509   : > { %2419 = vmatprep.mubr.msk.f32.mxu0 %vm2716_vm1, %v2717_v13  ;;  %2424 = vmatprep.mubr.msk.f32.mxu1 %vm2716_vm1, %v2717_v13 }
 0x50a   : > { %2420 = vmatmul.mubr.msk.f32.vlgmr.msra.gmra.mrb[4].mxu0 %vm1104_vm3, %v1451_v42  ;;  %2425 = vmatmul.mubr.msk.f32.vlgmr.msra.gmra.mrb[14].mxu1 %vm1104_vm3, %v1452_v43 }
 0x50b   : > { %2502 = vmatprep.subr.bf16.mxu0 %v2715_v10  ;;  %2435 = vmatprep.mubr.msk.f32.mxu0 %vm2716_vm1, %v2717_v13 }
 0x50c   : > { %2508 = vmatprep.subr.bf16.mxu1 %v2715_v10  ;;  %2446 = vmatprep.mubr.msk.f32.mxu1 %vm2716_vm1, %v2717_v13 }
 0x50d   : > { %2504 = vmatpush3.bf16.msra.mxu0 %v2503_v48 }
 0x50e   : > { %2505 = vmatprep.subr.bf16.mxu0 %v2715_v10 }
 0x511   : > { %2507 = vmatpush3.bf16.msra.mxu0 %v2506_v15 }
 0x512   : > { %2514 = vmatprep.subr.bf16.mxu0 %v2715_v10 }
 0x5d9   : > { %v1522_v49 = vpop.f32.mrb[2].mxu0  ;;  %v1595_v50 = vpop.f32.mrb[12].mxu1 }
 0x5da   : > { %v2411_v51 = vpop.f32.mrb[3].mxu0  ;;  %v2416_v52 = vpop.f32.mrb[13].mxu1 }
 0x5db   : > { %v2007_v51 = vld [vmem:[%s3284_s9 + $0x10] sm:$0xff]  ;;  %v2008_v52 = vld [vmem:[%s3284_s9 + $0x18] sm:$0xff] }
 0x5dd   : > { %v1668_v53 = vpop.f32.mrb[4].mxu0  ;;  %v1741_v55 = vpop.f32.mrb[14].mxu1 }
 0x5de   : > { %v1745_v56 = vcombine.low %v1522_v49, %v1668_v53  ;;  %v1746_v57 = vcombine.high %v1522_v49, %v1668_v53  ;;  %v1761_v58 = vcombine.low %v1595_v50, %v1741_v55  ;;  %v1762_v59 = vcombine.high %v1595_v50, %v1741_v55  ;;  %v2421_v61 = vpop.f32.mrb[5].mxu0  ;;  %v2426_v62 = vpop.f32.mrb[15].mxu1  ;;  %v2083_v55 = vld [vmem:[%s3285_s10] sm:$0xff] }
 0x5df   : > { %v2512_v53 = vpack.c.bf16 %v2008_v52, %v2007_v51  ;;  %v2087_v62 = vld [vmem:[%s3285_s10 + $0x20] sm:$0xff] }
 0x5e0   : > { %v1753_v63 = vrot.slane %v1745_v56, %v2987_v54  ;;  %v1760_v1 = vrot.slane %v1746_v57, %v2987_v54  ;;  %v1769_v2 = vrot.slane %v1761_v58, %v2987_v54  ;;  %v1776_v3 = vrot.slane %v1762_v59, %v2987_v54  ;;  %v2084_v56 = vld [vmem:[%s3285_s10 + $0x8] sm:$0xff]  ;;  %v2085_v57 = vld [vmem:[%s3285_s10 + $0x10] sm:$0xff]  ;;  %v2086_v59 = vld [vmem:[%s3285_s10 + $0x18] sm:$0xff] }
 0x5e1   : > { %v2515_v58 = vpack.c.bf16 %v2084_v56, %v2083_v55  ;;  %v2518_v61 = vpack.c.bf16 %v2086_v59, %v2085_v57 }
 0x5e2   : > { %v1777_v4 = vcombine.low %v1753_v63, %v1769_v2  ;;  %v1778_v5 = vcombine.high %v1753_v63, %v1769_v2  ;;  %v1793_v6 = vcombine.low %v1760_v1, %v1776_v3  ;;  %v1794_v7 = vcombine.high %v1760_v1, %v1776_v3  ;;  %v2088_v63 = vld [vmem:[%s3285_s10 + $0x28] sm:$0xff]  ;;  %v2089_v2 = vld [vmem:[%s3285_s10 + $0x30] sm:$0xff]  ;;  %v2090_v3 = vld [vmem:[%s3285_s10 + $0x38] sm:$0xff] }
 0x5e3   : > { %v2521_v1 = vpack.c.bf16 %v2088_v63, %v2087_v62 }
 0x5e4   : > { %v1785_v11 = vrot.slane %v1777_v4, %v2990_v60  ;;  %v1792_v12 = vrot.slane %v1778_v5, %v2990_v60  ;;  %v1801_v41 = vrot.slane %v1793_v6, %v2990_v60  ;;  %v1808_v14 = vrot.slane %v1794_v7, %v2990_v60  ;;  %v2091_v5 = vld [vmem:[%s3285_s10 + $0x40] sm:$0xff]  ;;  %v2092_v6 = vld [vmem:[%s3285_s10 + $0x48] sm:$0xff] }
 0x5e5   : > { %v2524_v4 = vpack.c.bf16 %v2090_v3, %v2089_v2  ;;  %v2527_v7 = vpack.c.bf16 %v2092_v6, %v2091_v5 }
 0x5e6   : > { %v1813_v16 = vcombine.low %v1785_v11, %v1792_v12  ;;  %v2286_v17 = vcombine.high %v1785_v11, %v1792_v12  ;;  %v1829_v18 = vcombine.low %v1801_v41, %v1808_v14  ;;  %v2287_v19 = vcombine.high %v1801_v41, %v1808_v14  ;;  %v2095_v12 = vld [vmem:[%s3285_s10 + $0x60] sm:$0xff]  ;;  %v2096_v41 = vld [vmem:[%s3285_s10 + $0x68] sm:$0xff] }
 0x5e7   : > { %v2530_v11 = vpack.c.bf16 %v2094_v9, %v2093_v8  ;;  %v2533_v14 = vpack.c.bf16 %v2096_v41, %v2095_v12 }
 0x5e8   : > { %v1820_v20 = vrot.slane %v1813_v16, %v2987_v54  ;;  %v1828_v21 = vrot.slane %v2286_v17, %v2987_v54  ;;  %v1836_v22 = vrot.slane %v1829_v18, %v2987_v54  ;;  %v1844_v23 = vrot.slane %v2287_v19, %v2987_v54  ;;  %v2289_v19 = vld [vmem:[%s3278_s3] ss:$0 sm:$0xff] }
 0x5ea   : > { %v1846_v24 = vcombine.high %v1820_v20, %v1828_v21  ;;  %v1862_v25 = vcombine.high %v1836_v22, %v1844_v23  ;;  %v1845_v26 = vcombine.low %v1820_v20, %v1828_v21  ;;  %v1861_v27 = vcombine.low %v1836_v22, %v1844_v23  ;;  %v2290_v21 = vld [vmem:[%s3279_s4] ss:$0 sm:$0xff] }
 0x5ec   : > { %v1860_v28 = vrot.slane %v1846_v24, %v2990_v60  ;;  %v1876_v44 = vrot.slane %v1862_v25, %v2990_v60  ;;  %v1853_v45 = vrot.slane %v1845_v26, %v2990_v60  ;;  %v1869_v29 = vrot.slane %v1861_v27, %v2990_v60  ;;  %v2098_v24 = vld [vmem:[%s3285_s10 + $0x78] sm:$0xff] }
 0x5ee   : > { %v1879_v30 = vcombine.low %v1860_v28, %v1876_v44  ;;  %v1878_v31 = vcombine.high %v1853_v45, %v1869_v29  ;;  %v1880_v32 = vcombine.high %v1860_v28, %v1876_v44  ;;  %v1877_v33 = vcombine.low %v1853_v45, %v1869_v29 }
 0x5f0   : > { %1886 = vrot.lane.b32.xlu1 %v1879_v30, %s2724_s26  ;;  %1882 = vrot.lane.b32.xlu0 %v1878_v31, %s2725_s24 }
 0x5f4   : > { %1890 = vrot.lane.b32.xlu0 %v1880_v32, %s2726_s25  ;;  %s3230_s25 = scalar_lea.hbm %s3286_s11, %s2293_s14 }
 0x662   : > { %v1883_v54 = vpop.permute.xlu0 %1882  ;;  %v1887_v34 = vpop.permute.xlu1 %1886 }
 0x663   : > { %v1893_v35 = vsel %vm1104_vm3, %v1877_v33, %v1883_v54 }
 0x664   : > { %v1895_v37 = vsel %vm1894_vm4, %v1893_v35, %v1887_v34 }
 0x666   : > { %v1891_v36 = vpop.permute.xlu0 %1890 }
 0x667   : > { %v1897_v38 = vsel %vm1896_vm5, %v1895_v37, %v1891_v36 }
 0x668   : > { %2436 = vmatmul.mubr.msk.f32.vlgmr.msra.gmra.mrb[6].mxu0 %vm405_vm0, %v1897_v38 }
 0x669   : > { %2481 = vmatprep.mubr.msk.f32.mxu0 %vm2716_vm1, %v2717_v13  ;;  %v2005_v13 = vld [vmem:[%s3284_s9] sm:$0xff]  ;;  %2516 = vmatpush3.bf16.msra.mxu0 %v2515_v58 }
 0x66a   : > { %2517 = vmatprep.subr.bf16.mxu0 %v2715_v10 }
 0x66d   : > { %2519 = vmatpush3.bf16.msra.mxu0 %v2518_v61 }
 0x66e   : > { %2520 = vmatprep.subr.bf16.mxu0 %v2715_v10 }
 0x671   : > { %2522 = vmatpush3.bf16.msra.mxu0 %v2521_v1 }
 0x672   : > { %2523 = vmatprep.subr.bf16.mxu0 %v2715_v10 }
 0x675   : > { %2525 = vmatpush3.bf16.msra.mxu0 %v2524_v4 }
 0x676   : > { %2526 = vmatprep.subr.bf16.mxu0 %v2715_v10 }
 0x679   : > { %2528 = vmatpush3.bf16.msra.mxu0 %v2527_v7 }
 0x67a   : > { %2529 = vmatprep.subr.bf16.mxu0 %v2715_v10 }
 0x67d   : > { %2531 = vmatpush3.bf16.msra.mxu0 %v2530_v11 }
 0x67e   : > { %2532 = vmatprep.subr.bf16.mxu0 %v2715_v10 }
 0x681   : > { %2534 = vmatpush3.bf16.msra.mxu0 %v2533_v14 }
 0x682   : > { %2535 = vmatprep.subr.bf16.mxu0 %v2715_v10 }
 0x73b   : > { %v1971_v60 = vpop.f32.mrb[6].mxu0 }
 0x73c   : > { %v3142_v39 = vadd.f32 %v1971_v60, %v2903_v0  ;;  %v2437_v40 = vpop.f32.mrb[7].mxu0  ;;  %v2006_v0 = vld [vmem:[%s3284_s9 + $0x8] sm:$0xff] }
 0x73d   : > { %v2509_v50 = vpack.c.bf16 %v2006_v0, %v2005_v13 }
 0x73e   : > { %v1978_v42 = vsel %vm405_vm0, %v3142_v39, 0.0 }
 0x73f   : > { %1979 = vadd.xlane.f32.xlu1 %v1978_v42  ;;  %2510 = vmatpush3.bf16.msra.mxu1 %v2509_v50 }
 0x740   : > { %2511 = vmatprep.subr.bf16.mxu1 %v2715_v10  ;;  %v2097_v10 = vld [vmem:[%s3285_s10 + $0x70] sm:$0xff] }
 0x741   : > { %v2536_v25 = vpack.c.bf16 %v2098_v24, %v2097_v10 }
 0x743   : > { %2513 = vmatpush3.bf16.msra.mxu1 %v2512_v53  ;;  %2537 = vmatpush3.bf16.msra.mxu0 %v2536_v25 }
 0x7cc   : > { %v1980_v43 = vpop.xlane.xlu1 %1979 }
 0x7cd   : > { %v1981_v46 = vmul.f32 0.03125, %v1980_v43 }
 0x7cf   : > { %v1982_v47 = vsub.f32 %v3142_v39, %v1981_v46 }
 0x7d1   : > { %v1983_v48 = vmul.f32 %v1982_v47, %v1982_v47 }
 0x7d3   : > { %v1984_v49 = vsel %vm405_vm0, %v1983_v48, 0.0 }
 0x7d4   : > { %1985 = vadd.xlane.f32.xlu0 %v1984_v49 }
 0x861   : > { %v1986_v15 = vpop.xlane.xlu0 %1985 }
 0x862   : > { %v1987_v16 = vmul.f32 0.03125, %v1986_v15 }
 0x864   : > { %v1988_v17 = vadd.f32 1e-05, %v1987_v16 }
 0x866   : > { %2614 = vrsqrt.f32 %v1988_v17 }
 0x870   : > { %v2615_v18 = vpop.eup %2614 }
 0x871   : > { %v1990_v20 = vmul.f32 %v2615_v18, %v1982_v47 }
 0x873   : > { %v1997_v22 = vmul.f32 %v2289_v19, %v1990_v20 }
 0x875   : > { %v2004_v23 = vadd.f32 %v2290_v21, %v1997_v22 }
 0x877   : > { %2447 = vmatmul.mubr.msk.f32.vlgmr.msra.gmra.mrb[16].mxu1 %vm405_vm0, %v2004_v23 }
 0x94a   : > { %v2078_v26 = vpop.f32.mrb[16].mxu1 }
 0x94b   : > { %v2082_v27 = vmax.f32 %v2078_v26, 0.0  ;;  %v2448_v28 = vpop.f32.mrb[17].mxu1 }
 0x94d   : > { %2482 = vmatmul.mubr.f32.vlgmr.msra.gmra.mrb[8].mxu0 %v2082_v27 }
 0xa20   : > { %v2165_v44 = vpop.f32.mrb[8].mxu0 }
 0xa21   : > { %v2169_v45 = vadd.f32 %v2165_v44, %v3142_v39  ;;  %v2483_v29 = vpop.f32.mrb[9].mxu0 }
 0xa23   : > { %2170 = vst.msk [vmem:[%s401_s19] sm:$0xff] %vm405_vm0, %v2169_v45 }
 0xa24   : > { %2659 = shalt.err (!%p2656_p4)
}
 0xa25   : > { %s2660_s13 = scalar_lea.hbm %s3230_s25, 128  ;;  %s2664_s19 = scalar_lea.hbm %s3286_s11, 256 }
 0xa26   : > { %p2661_p5 = scmp.ne.s32.totalorder %s3230_s25, %s2660_s13  ;;  %p2665_p0 = scmp.lt.u32.totalorder %s3230_s25, %s3286_s11 }
 0xa27   : > { %p2666_p1 = scmp.lt.u32.totalorder %s2664_s19, %s2660_s13  ;;  %p2668_p6 = scmp.lt.u32.totalorder %s2660_s13, %s3230_s25 }
 0xa28   : > { %p2662_p8 = pnand %p2661_p5, %p3298_p11 }
 0xa29   : > { %p2667_p3 = por %p2666_p1, %p2665_p0 }
 0xa2a   : > { %p2663_p9 = pneg %p2662_p8 }
 0xa2b   : > { %p2669_p12 = por %p2668_p6, %p2667_p3 }
 0xa2d   : > { %p2670_p13 = pnand %p2669_p12, %p2663_p9 }
 0xa2f   : > { %2673 = shalt.err (!%p2670_p13)
}
 0xa30   : > { %2540 = dma.vmem_to_hbm [thread:$0]  (%p3298_p11), %s3232_s22, 128, %s3230_s25, %s2172_s21  }
 0xa31 PF: > { %s2197_s28 = sand.u32 1, %s2700_s17   ;;  %p3299_p7 = scmp.ne.s32.totalorder %s3294_s30, 0 }
 0xa32   : > { %p3300_p10 = scmp.ge.s32.totalorder %s2712_s20, 2  ;;  %s2198_s16 = scalar_lea.sflag [#allocation4], %s2197_s28 }
 0xa34   : > { %p2547_p2 = pnand %p3300_p10, %p3299_p7 }
 0xa36   : > { %2695 = dma.done.wait (!%p2547_p2), %s2198_s16, 128  }
 0xa37   : > { %2697 = vsyncadd (!%p2547_p2), %s2198_s16, 4294967168  ;;  %s3301_s15 = sld [smem:[#allocation8_spill]]  ;;  %s3302_s19 = sld [smem:[#allocation9_spill]] }
 0xa38   : > { %p24_p4 = scmp.ge.s32.totalorder %s2813_s23, 4   ;;  %s3303_s17 = smov %s2704_s18 }
 0xa39   : > { %s3305_s20 = smov %s2813_s23 }
 0xa3a   :  { %26 = sbr.rel (!%p24_p4) target bundleno = 5 (0x5), region = 109 }
 0xa3d   : > { %s3304_s18 = smov %s3301_s15 }
 0xa41   :  { %2203 = vsyncpa [#allocation3], 1 }
 0xa42   :  { %2205 = vsyncpa [#allocation3 + $0x1], 1 }
 0xa43   :  { %2206 = vsyncpa [#allocation4], 1 }
 0xa44   :  { %2208 = vsyncpa [#allocation4 + $0x1], 1 }

</bundles_post_ra>
